<compile_context>
chip_gen: v5e
topology: v5e:2x2
jax: 0.10.0
libtpu: 0.0.40
codegen_flags: <defaults>
</compile_context>

<pallas_src>
import jax
import jax.numpy as jnp
from jax.experimental import pallas as pl
from jax.experimental.pallas import tpu as pltpu

HIDDEN = 128       # fc6 / fc7 / pc-fc / fusion-predictor hidden width
HEAD_SLOTS = 128   # lane-dense fused head output width (>= sum of head widths)


def _box3d_head_kernel(
    # activations (row tile, f32 in HBM/VMEM; cast to bf16 on-tile)
    pooled_ref, pc_ref,
    # weights (VMEM-resident, bf16)
    w6_ref, w7_ref, wpc_ref, wfx_ref, wfp_ref, whr_ref, whp_ref,
    # packed biases (f32)
    bh_ref, bhead_ref,
    # single fused output: [ x (H) | heads (HEAD_SLOTS) ]
    out_ref,
):
    f32, bf16 = jnp.float32, jnp.bfloat16
    H = w7_ref.shape[1]

    pooled = pooled_ref[...].astype(bf16)   # (TN, D_pool)
    pc = pc_ref[...].astype(bf16)           # (TN, D_pc)

    b6 = bh_ref[0:1, :]
    b7 = bh_ref[1:2, :]
    bpc = bh_ref[2:3, :]
    bp = bh_ref[3:4, :]

    # --- feature_extractor: fc6 -> relu -> fc7 -> relu ---
    h = jnp.dot(pooled, w6_ref[...], preferred_element_type=f32) + b6
    h = jnp.maximum(h, 0.0)
    x = jnp.dot(h.astype(bf16), w7_ref[...], preferred_element_type=f32) + b7
    x = jnp.maximum(x, 0.0)

    # --- pc_feature_extractor: fc -> relu ---
    pcf = jnp.dot(pc, wpc_ref[...], preferred_element_type=f32) + bpc
    pcf = jnp.maximum(pcf, 0.0)

    x_bf = x.astype(bf16)
    pcf_bf = pcf.astype(bf16)

    # --- predictor on fusion = concat([x, pcf], 1): split-K accumulate (no copy)
    roi = jnp.dot(x_bf, wfx_ref[...], preferred_element_type=f32)
    roi = roi + jnp.dot(pcf_bf, wfp_ref[...], preferred_element_type=f32) + bp
    roi = jnp.maximum(roi, 0.0)

    # --- all five heads fused into one lane-dense slab, split-K over {roi, pcf}
    #     (dim | rot_conf | rot_reg | loc_conv are roi-driven, loc_pc is pcf-driven)
    heads = jnp.dot(roi.astype(bf16), whr_ref[...], preferred_element_type=f32)
    heads = heads + jnp.dot(pcf_bf, whp_ref[...], preferred_element_type=f32)
    heads = heads + bhead_ref[...]

    out_ref[:, 0:H] = x.astype(out_ref.dtype)
    out_ref[:, H:H + HEAD_SLOTS] = heads.astype(out_ref.dtype)


def pack_box3d_params(params):
    """Pack raw per-layer params once (at model load) into the bf16 / lane-dense
    layout the kernel consumes. Returns (packed dict, per-head output widths)."""
    f32, bf16 = jnp.float32, jnp.bfloat16
    H = params["w7"].shape[1]

    head_specs = [("wdim", "bdim"), ("wrc", "brc"), ("wrr", "brr"),
                  ("wlc", "blc"), ("wlp", "blp")]
    widths = [params[w].shape[1] for w, _ in head_specs]
    assert sum(widths) <= HEAD_SLOTS

    whead_roi = jnp.zeros((H, HEAD_SLOTS), f32)
    whead_pc = jnp.zeros((H, HEAD_SLOTS), f32)
    bhead = jnp.zeros((1, HEAD_SLOTS), f32)
    col = 0
    for (wk, bk), d in zip(head_specs, widths):
        if wk == "wlp":                      # loc_pc head is driven by pc features
            whead_pc = whead_pc.at[:, col:col + d].set(params[wk])
        else:
            whead_roi = whead_roi.at[:, col:col + d].set(params[wk])
        bhead = bhead.at[:, col:col + d].set(params[bk])
        col += d

    bh = jnp.zeros((8, H), f32)              # sublane-aligned packed hidden biases
    bh = bh.at[0:1].set(params["b6"])
    bh = bh.at[1:2].set(params["b7"])
    bh = bh.at[2:3].set(params["bpc"])
    bh = bh.at[3:4].set(params["bp"])

    packed = dict(
        w6=params["w6"].astype(bf16),
        w7=params["w7"].astype(bf16),
        wpc=params["wpc"].astype(bf16),
        wfus_x=params["wpx"].astype(bf16),
        wfus_pc=params["wppc"].astype(bf16),
        whead_roi=whead_roi.astype(bf16),
        whead_pc=whead_pc.astype(bf16),
        bh=bh,
        bhead=bhead,
    )
    return packed, widths


def _choose_tile_n(n, max_tile):
    """16-row granule; minimal padding at tiny N, >=2 balanced steps at large N."""
    n16 = pl.cdiv(max(n, 1), 16) * 16
    if n16 <= max_tile:
        tile = n16 if n16 <= 256 else pl.cdiv(pl.cdiv(n16, 2), 16) * 16
    else:
        tile = max_tile
    n_pad = pl.cdiv(n16, tile) * tile
    return tile, n_pad


def roi_box3d_head_forward(pooled, pc_pooled, packed, head_widths, *,
                           max_tile_n=512):
    """pooled: [N, D_pool] f32, pc_pooled: [N, D_pc] f32, packed params from
    pack_box3d_params -> (x, dim, rot_conf, rot_reg, loc_conv, loc_pc) f32."""
    N, d_pool = pooled.shape
    d_pc = pc_pooled.shape[1]
    H = packed["w7"].shape[1]
    out_w = H + HEAD_SLOTS

    tile_n, n_pad = _choose_tile_n(N, max_tile_n)
    pooled_p = jnp.pad(pooled, ((0, n_pad - N), (0, 0)))     # row pad only, stays f32
    pc_p = jnp.pad(pc_pooled, ((0, n_pad - N), (0, 0)))

    grid = (n_pad // tile_n,)

    def row_spec(width):
        return pl.BlockSpec((tile_n, width), lambda i: (i, 0))

    def const_spec(arr):
        return pl.BlockSpec(arr.shape, lambda i: (0, 0))

    weight_order = ["w6", "w7", "wpc", "wfus_x", "wfus_pc",
                    "whead_roi", "whead_pc", "bh", "bhead"]
    in_specs = [row_spec(d_pool), row_spec(d_pc)] + \
               [const_spec(packed[k]) for k in weight_order]
    out_spec = row_spec(out_w)
    out_shape = jax.ShapeDtypeStruct((n_pad, out_w), jnp.float32)

    flops = 2 * n_pad * (d_pool * H + H * H + d_pc * H
                         + 2 * H * H + 2 * H * HEAD_SLOTS)
    bytes_accessed = int(
        pooled_p.size * 4 + pc_p.size * 4
        + sum(int(packed[k].size) * packed[k].dtype.itemsize for k in weight_order)
        + n_pad * out_w * 4)
    cost = pl.CostEstimate(flops=int(flops), transcendentals=0,
                           bytes_accessed=bytes_accessed)

    out_full = pl.pallas_call(
        _box3d_head_kernel,
        out_shape=out_shape,
        grid=grid,
        in_specs=in_specs,
        out_specs=out_spec,
        compiler_params=pltpu.CompilerParams(
            dimension_semantics=("parallel",)),
        cost_estimate=cost,
    )(pooled_p, pc_p, *[packed[k] for k in weight_order])

    x = out_full[:N, :H]
    heads = out_full[:N, H:]
    outs = []
    col = 0
    for w in head_widths:
        outs.append(heads[:, col:col + w])
        col += w
    # (x, dim, rot_conf, rot_reg, loc_conv, loc_pc)
    return (x, *outs)


def init_params(key, d_pool, d_pc_pool, hidden, n_bins=2):
    """Deterministic synthetic parameters; linear weights stored as [in, out]."""
    def dense(key, din, dout):
        kw, kb = jax.random.split(key)
        w = jax.random.normal(kw, (din, dout), jnp.float32) * 0.02
        b = jax.random.normal(kb, (1, dout), jnp.float32) * 0.01
        return w, b

    keys = jax.random.split(key, 10)
    p = {}
    p["w6"], p["b6"] = dense(keys[0], d_pool, hidden)        # fc6
    p["w7"], p["b7"] = dense(keys[1], hidden, hidden)         # fc7
    p["wpc"], p["bpc"] = dense(keys[2], d_pc_pool, hidden)    # pc feature extractor fc
    # fusion predictor: Linear(2*hidden -> hidden), split over the concat axis
    wp, bp = dense(keys[3], 2 * hidden, hidden)
    p["wpx"], p["wppc"], p["bp"] = wp[:hidden], wp[hidden:], bp
    p["wdim"], p["bdim"] = dense(keys[4], hidden, 3)          # 3D dims (h, w, l)
    p["wrc"], p["brc"] = dense(keys[5], hidden, n_bins)       # rotation bin conf
    p["wrr"], p["brr"] = dense(keys[6], hidden, 2 * n_bins)   # sin/cos per bin
    p["wlc"], p["blc"] = dense(keys[7], hidden, 3)            # localization (conv)
    p["wlp"], p["blp"] = dense(keys[8], hidden, 3)            # localization (pc)
    return p


def _reference(pooled, pc_pooled, p):
    relu = lambda v: jnp.maximum(v, 0.0)
    x = relu(relu(pooled @ p["w6"] + p["b6"]) @ p["w7"] + p["b7"])
    pcf = relu(pc_pooled @ p["wpc"] + p["bpc"])
    fusion = jnp.concatenate([x, pcf], axis=1)
    roi = relu(fusion @ jnp.concatenate([p["wpx"], p["wppc"]], axis=0) + p["bp"])
    return (x,
            roi @ p["wdim"] + p["bdim"],
            roi @ p["wrc"] + p["brc"],
            roi @ p["wrr"] + p["brr"],
            roi @ p["wlc"] + p["blc"],
            pcf @ p["wlp"] + p["blp"])


if __name__ == "__main__":
    key = jax.random.PRNGKey(0)
    k_in, k_pc, k_par = jax.random.split(key, 3)

    # Small, forward-consistent shapes:
    #   N=8 positive ROIs; pooled image ROI feats = C(4) x 8 x 8 flattened = 256;
    #   pooled pseudo-PC ROI feats = 3 x 8 x 8 flattened = 192; hidden = 128.
    N, D_POOL, D_PC_POOL = 8, 256, 192

    pooled = jax.random.normal(k_in, (N, D_POOL), jnp.float32)
    pc_pooled = jax.random.normal(k_pc, (N, D_PC_POOL), jnp.float32)
    params = init_params(k_par, D_POOL, D_PC_POOL, HIDDEN)

    # Pack/cast weights once (model-load time), outside the inference hot path.
    packed, head_widths = pack_box3d_params(params)
    packed = jax.tree_util.tree_map(jax.block_until_ready, packed)

    outs = roi_box3d_head_forward(pooled, pc_pooled, packed, head_widths)
    outs = jax.block_until_ready(outs)

    refs = _reference(pooled, pc_pooled, params)
    for o, r in zip(outs, refs):
        assert o.shape == r.shape and o.dtype == r.dtype, (o.shape, r.shape)
        # bf16 matmul operands (f32 accumulation) -> relaxed tolerance vs f32 ref
        assert jnp.allclose(o, r, atol=2e-2, rtol=2e-2)

    print("KERNEL_OK")
</pallas_src>

<mosaic_0001>
module attributes {stable_mosaic.version = 11 : i64} {
  func.func @_box3d_head_kernel(%arg0: i32, %arg1: memref<16x256xf32, #tpu.memory_space<vmem>>, %arg2: memref<16x192xf32, #tpu.memory_space<vmem>>, %arg3: memref<256x128xbf16, #tpu.memory_space<vmem>>, %arg4: memref<128x128xbf16, #tpu.memory_space<vmem>>, %arg5: memref<192x128xbf16, #tpu.memory_space<vmem>>, %arg6: memref<128x128xbf16, #tpu.memory_space<vmem>>, %arg7: memref<128x128xbf16, #tpu.memory_space<vmem>>, %arg8: memref<128x128xbf16, #tpu.memory_space<vmem>>, %arg9: memref<128x128xbf16, #tpu.memory_space<vmem>>, %arg10: memref<8x128xf32, #tpu.memory_space<vmem>>, %arg11: memref<1x128xf32, #tpu.memory_space<vmem>>, %arg12: memref<16x256xf32, #tpu.memory_space<vmem>>) attributes {dimension_semantics = [#tpu.dimension_semantics<parallel>], iteration_bounds = array<i64: 1>, scalar_prefetch = 0 : i64, scratch_operands = 0 : i64, tpu.core_type = #tpu.core_type<tc>, window_params = [{transform_indices = @transform_0, window_bounds = array<i64: 16, 256>}, {transform_indices = @transform_1, window_bounds = array<i64: 16, 192>}, {pipeline_mode = #tpu.pipeline_mode<synchronous>, transform_indices = @transform_2, window_bounds = array<i64: 256, 128>}, {pipeline_mode = #tpu.pipeline_mode<synchronous>, transform_indices = @transform_3, window_bounds = array<i64: 128, 128>}, {pipeline_mode = #tpu.pipeline_mode<synchronous>, transform_indices = @transform_4, window_bounds = array<i64: 192, 128>}, {pipeline_mode = #tpu.pipeline_mode<synchronous>, transform_indices = @transform_5, window_bounds = array<i64: 128, 128>}, {pipeline_mode = #tpu.pipeline_mode<synchronous>, transform_indices = @transform_6, window_bounds = array<i64: 128, 128>}, {pipeline_mode = #tpu.pipeline_mode<synchronous>, transform_indices = @transform_7, window_bounds = array<i64: 128, 128>}, {pipeline_mode = #tpu.pipeline_mode<synchronous>, transform_indices = @transform_8, window_bounds = array<i64: 128, 128>}, {pipeline_mode = #tpu.pipeline_mode<synchronous>, transform_indices = @transform_9, window_bounds = array<i64: 8, 128>}, {pipeline_mode = #tpu.pipeline_mode<synchronous>, transform_indices = @transform_10, window_bounds = array<i64: 1, 128>}, {transform_indices = @transform_11, window_bounds = array<i64: 16, 256>}]} {
    %c0 = arith.constant 0 : index
    %c0_0 = arith.constant 0 : index
    %0 = vector.load %arg1[%c0, %c0_0] : memref<16x256xf32, #tpu.memory_space<vmem>>, vector<16x256xf32>
    %1 = arith.truncf %0 : vector<16x256xf32> to vector<16x256xbf16>
    %c0_1 = arith.constant 0 : index
    %c0_2 = arith.constant 0 : index
    %2 = vector.load %arg2[%c0_1, %c0_2] : memref<16x192xf32, #tpu.memory_space<vmem>>, vector<16x192xf32>
    %3 = arith.truncf %2 : vector<16x192xf32> to vector<16x192xbf16>
    %c0_3 = arith.constant 0 : index
    %c0_4 = arith.constant 0 : index
    %4 = vector.load %arg10[%c0_3, %c0_4] : memref<8x128xf32, #tpu.memory_space<vmem>>, vector<1x128xf32>
    %c1 = arith.constant 1 : index
    %c0_5 = arith.constant 0 : index
    %5 = vector.load %arg10[%c1, %c0_5] : memref<8x128xf32, #tpu.memory_space<vmem>>, vector<1x128xf32>
    %c2 = arith.constant 2 : index
    %c0_6 = arith.constant 0 : index
    %6 = vector.load %arg10[%c2, %c0_6] : memref<8x128xf32, #tpu.memory_space<vmem>>, vector<1x128xf32>
    %c3 = arith.constant 3 : index
    %c0_7 = arith.constant 0 : index
    %7 = vector.load %arg10[%c3, %c0_7] : memref<8x128xf32, #tpu.memory_space<vmem>>, vector<1x128xf32>
    %c0_8 = arith.constant 0 : index
    %c0_9 = arith.constant 0 : index
    %8 = vector.load %arg3[%c0_8, %c0_9] : memref<256x128xbf16, #tpu.memory_space<vmem>>, vector<256x128xbf16>
    %cst = arith.constant dense<0.000000e+00> : vector<16x128xf32>
    %9 = tpu.matmul %1, %8, %cst {dimension_numbers = #tpu.dot_dimension_numbers<[1], [0], [0], [1], [0, 0, 1, 1], [], []>} : vector<16x256xbf16>, vector<256x128xbf16>, vector<16x128xf32> -> vector<16x128xf32>
    %10 = vector.broadcast %4 : vector<1x128xf32> to vector<16x128xf32>
    %11 = arith.addf %9, %10 : vector<16x128xf32>
    %cst_10 = arith.constant 0.000000e+00 : f32
    %12 = vector.broadcast %cst_10 : f32 to vector<16x128xf32>
    %13 = arith.maximumf %11, %12 : vector<16x128xf32>
    %14 = arith.truncf %13 : vector<16x128xf32> to vector<16x128xbf16>
    %c0_11 = arith.constant 0 : index
    %c0_12 = arith.constant 0 : index
    %15 = vector.load %arg4[%c0_11, %c0_12] : memref<128x128xbf16, #tpu.memory_space<vmem>>, vector<128x128xbf16>
    %cst_13 = arith.constant dense<0.000000e+00> : vector<16x128xf32>
    %16 = tpu.matmul %14, %15, %cst_13 {dimension_numbers = #tpu.dot_dimension_numbers<[1], [0], [0], [1], [0, 0, 1, 1], [], []>} : vector<16x128xbf16>, vector<128x128xbf16>, vector<16x128xf32> -> vector<16x128xf32>
    %17 = vector.broadcast %5 : vector<1x128xf32> to vector<16x128xf32>
    %18 = arith.addf %16, %17 : vector<16x128xf32>
    %cst_14 = arith.constant 0.000000e+00 : f32
    %19 = vector.broadcast %cst_14 : f32 to vector<16x128xf32>
    %20 = arith.maximumf %18, %19 : vector<16x128xf32>
    %c0_15 = arith.constant 0 : index
    %c0_16 = arith.constant 0 : index
    %21 = vector.load %arg5[%c0_15, %c0_16] : memref<192x128xbf16, #tpu.memory_space<vmem>>, vector<192x128xbf16>
    %cst_17 = arith.constant dense<0.000000e+00> : vector<16x128xf32>
    %22 = tpu.matmul %3, %21, %cst_17 {dimension_numbers = #tpu.dot_dimension_numbers<[1], [0], [0], [1], [0, 0, 1, 1], [], []>} : vector<16x192xbf16>, vector<192x128xbf16>, vector<16x128xf32> -> vector<16x128xf32>
    %23 = vector.broadcast %6 : vector<1x128xf32> to vector<16x128xf32>
    %24 = arith.addf %22, %23 : vector<16x128xf32>
    %cst_18 = arith.constant 0.000000e+00 : f32
    %25 = vector.broadcast %cst_18 : f32 to vector<16x128xf32>
    %26 = arith.maximumf %24, %25 : vector<16x128xf32>
    %27 = arith.truncf %20 : vector<16x128xf32> to vector<16x128xbf16>
    %28 = arith.truncf %26 : vector<16x128xf32> to vector<16x128xbf16>
    %c0_19 = arith.constant 0 : index
    %c0_20 = arith.constant 0 : index
    %29 = vector.load %arg6[%c0_19, %c0_20] : memref<128x128xbf16, #tpu.memory_space<vmem>>, vector<128x128xbf16>
    %cst_21 = arith.constant dense<0.000000e+00> : vector<16x128xf32>
    %30 = tpu.matmul %27, %29, %cst_21 {dimension_numbers = #tpu.dot_dimension_numbers<[1], [0], [0], [1], [0, 0, 1, 1], [], []>} : vector<16x128xbf16>, vector<128x128xbf16>, vector<16x128xf32> -> vector<16x128xf32>
    %c0_22 = arith.constant 0 : index
    %c0_23 = arith.constant 0 : index
    %31 = vector.load %arg7[%c0_22, %c0_23] : memref<128x128xbf16, #tpu.memory_space<vmem>>, vector<128x128xbf16>
    %cst_24 = arith.constant dense<0.000000e+00> : vector<16x128xf32>
    %32 = tpu.matmul %28, %31, %cst_24 {dimension_numbers = #tpu.dot_dimension_numbers<[1], [0], [0], [1], [0, 0, 1, 1], [], []>} : vector<16x128xbf16>, vector<128x128xbf16>, vector<16x128xf32> -> vector<16x128xf32>
    %33 = arith.addf %30, %32 : vector<16x128xf32>
    %34 = vector.broadcast %7 : vector<1x128xf32> to vector<16x128xf32>
    %35 = arith.addf %33, %34 : vector<16x128xf32>
    %cst_25 = arith.constant 0.000000e+00 : f32
    %36 = vector.broadcast %cst_25 : f32 to vector<16x128xf32>
    %37 = arith.maximumf %35, %36 : vector<16x128xf32>
    %38 = arith.truncf %37 : vector<16x128xf32> to vector<16x128xbf16>
    %c0_26 = arith.constant 0 : index
    %c0_27 = arith.constant 0 : index
    %39 = vector.load %arg8[%c0_26, %c0_27] : memref<128x128xbf16, #tpu.memory_space<vmem>>, vector<128x128xbf16>
    %cst_28 = arith.constant dense<0.000000e+00> : vector<16x128xf32>
    %40 = tpu.matmul %38, %39, %cst_28 {dimension_numbers = #tpu.dot_dimension_numbers<[1], [0], [0], [1], [0, 0, 1, 1], [], []>} : vector<16x128xbf16>, vector<128x128xbf16>, vector<16x128xf32> -> vector<16x128xf32>
    %c0_29 = arith.constant 0 : index
    %c0_30 = arith.constant 0 : index
    %41 = vector.load %arg9[%c0_29, %c0_30] : memref<128x128xbf16, #tpu.memory_space<vmem>>, vector<128x128xbf16>
    %cst_31 = arith.constant dense<0.000000e+00> : vector<16x128xf32>
    %42 = tpu.matmul %28, %41, %cst_31 {dimension_numbers = #tpu.dot_dimension_numbers<[1], [0], [0], [1], [0, 0, 1, 1], [], []>} : vector<16x128xbf16>, vector<128x128xbf16>, vector<16x128xf32> -> vector<16x128xf32>
    %43 = arith.addf %40, %42 : vector<16x128xf32>
    %c0_32 = arith.constant 0 : index
    %c0_33 = arith.constant 0 : index
    %44 = vector.load %arg11[%c0_32, %c0_33] : memref<1x128xf32, #tpu.memory_space<vmem>>, vector<1x128xf32>
    %45 = vector.broadcast %44 : vector<1x128xf32> to vector<16x128xf32>
    %46 = arith.addf %43, %45 : vector<16x128xf32>
    %c0_34 = arith.constant 0 : index
    %c0_35 = arith.constant 0 : index
    %47 = vector.load %arg12[%c0_34, %c0_35] : memref<16x256xf32, #tpu.memory_space<vmem>>, vector<16x128xf32>
    tpu.vector_store %arg12[%c0_34, %c0_35], %20 {strides = array<i32>} : memref<16x256xf32, #tpu.memory_space<vmem>>, vector<16x128xf32>,
    %c0_36 = arith.constant 0 : index
    %c128 = arith.constant 128 : index
    %48 = vector.load %arg12[%c0_36, %c128] : memref<16x256xf32, #tpu.memory_space<vmem>>, vector<16x128xf32>
    tpu.vector_store %arg12[%c0_36, %c128], %46 {strides = array<i32>} : memref<16x256xf32, #tpu.memory_space<vmem>>, vector<16x128xf32>,
    return
  }
  func.func @transform_0(%arg0: i32) -> (i32, i32) {
    %c0_i32 = arith.constant 0 : i32
    %c0_i32_0 = arith.constant 0 : i32
    return %arg0, %c0_i32 : i32, i32
  }
  func.func @transform_1(%arg0: i32) -> (i32, i32) {
    %c0_i32 = arith.constant 0 : i32
    %c0_i32_0 = arith.constant 0 : i32
    return %arg0, %c0_i32 : i32, i32
  }
  func.func @transform_2(%arg0: i32) -> (i32, i32) {
    %c0_i32 = arith.constant 0 : i32
    %c0_i32_0 = arith.constant 0 : i32
    %c0_i32_1 = arith.constant 0 : i32
    return %c0_i32, %c0_i32_0 : i32, i32
  }
  func.func @transform_3(%arg0: i32) -> (i32, i32) {
    %c0_i32 = arith.constant 0 : i32
    %c0_i32_0 = arith.constant 0 : i32
    %c0_i32_1 = arith.constant 0 : i32
    return %c0_i32, %c0_i32_0 : i32, i32
  }
  func.func @transform_4(%arg0: i32) -> (i32, i32) {
    %c0_i32 = arith.constant 0 : i32
    %c0_i32_0 = arith.constant 0 : i32
    %c0_i32_1 = arith.constant 0 : i32
    return %c0_i32, %c0_i32_0 : i32, i32
  }
  func.func @transform_5(%arg0: i32) -> (i32, i32) {
    %c0_i32 = arith.constant 0 : i32
    %c0_i32_0 = arith.constant 0 : i32
    %c0_i32_1 = arith.constant 0 : i32
    return %c0_i32, %c0_i32_0 : i32, i32
  }
  func.func @transform_6(%arg0: i32) -> (i32, i32) {
    %c0_i32 = arith.constant 0 : i32
    %c0_i32_0 = arith.constant 0 : i32
    %c0_i32_1 = arith.constant 0 : i32
    return %c0_i32, %c0_i32_0 : i32, i32
  }
  func.func @transform_7(%arg0: i32) -> (i32, i32) {
    %c0_i32 = arith.constant 0 : i32
    %c0_i32_0 = arith.constant 0 : i32
    %c0_i32_1 = arith.constant 0 : i32
    return %c0_i32, %c0_i32_0 : i32, i32
  }
  func.func @transform_8(%arg0: i32) -> (i32, i32) {
    %c0_i32 = arith.constant 0 : i32
    %c0_i32_0 = arith.constant 0 : i32
    %c0_i32_1 = arith.constant 0 : i32
    return %c0_i32, %c0_i32_0 : i32, i32
  }
  func.func @transform_9(%arg0: i32) -> (i32, i32) {
    %c0_i32 = arith.constant 0 : i32
    %c0_i32_0 = arith.constant 0 : i32
    %c0_i32_1 = arith.constant 0 : i32
    return %c0_i32, %c0_i32_0 : i32, i32
  }
  func.func @transform_10(%arg0: i32) -> (i32, i32) {
    %c0_i32 = arith.constant 0 : i32
    %c0_i32_0 = arith.constant 0 : i32
    %c0_i32_1 = arith.constant 0 : i32
    return %c0_i32, %c0_i32_0 : i32, i32
  }
  func.func @transform_11(%arg0: i32) -> (i32, i32) {
    %c0_i32 = arith.constant 0 : i32
    %c0_i32_0 = arith.constant 0 : i32
    return %arg0, %c0_i32 : i32, i32
  }
}

</mosaic_0001>

<bundles_post_ra>
// kernel: tpu_custom_call.1
= control target key start
LH: loop header
LB: loop body
LE: loop exit
PB: predicated region body
PF: predicated region fallthrough
CT: control target
= control target key end

     0   :  { %16 = vsyncpa [#allocation3], 0  ;;  %s1682_s0 = inlined_call_operand.hbm [shape: f32[16,256], index: 0, kind: input, shape index: {}]   ;;  %s1683_s1 = inlined_call_operand.hbm [shape: f32[16,192], index: 1, kind: input, shape index: {}]   ;;  %s1684_s2 = inlined_call_operand.hbm [shape: bf16[256,128], index: 2, kind: input, shape index: {}]   ;;  %s1685_s3 = inlined_call_operand.hbm [shape: bf16[128,128], index: 3, kind: input, shape index: {}]   ;;  %s1686_s4 = inlined_call_operand.hbm [shape: bf16[192,128], index: 4, kind: input, shape index: {}]   ;;  %s1687_s5 = inlined_call_operand.hbm [shape: bf16[128,128], index: 5, kind: input, shape index: {}]   ;;  %s1688_s6 = inlined_call_operand.hbm [shape: bf16[128,128], index: 6, kind: input, shape index: {}]   ;;  %s1689_s7 = inlined_call_operand.hbm [shape: bf16[128,128], index: 7, kind: input, shape index: {}]   ;;  %s1690_s8 = inlined_call_operand.hbm [shape: bf16[128,128], index: 8, kind: input, shape index: {}]   ;;  %s1691_s9 = inlined_call_operand.vmem [shape: f32[8,128], index: 9, kind: input, shape index: {}]   ;;  %s1692_s10 = inlined_call_operand.vmem [shape: f32[1,128], index: 10, kind: input, shape index: {}]   ;;  %s1693_s11 = inlined_call_operand.hbm [shape: f32[16,256], index: 11, kind: output, shape index: {}]  }
   0x1   :  { %17 = vsyncpa [#allocation6], 0 }
   0x2   :  { %18 = vsyncpa [#allocation9], 0 }
   0x3   :  { %19 = vsyncpa [#allocation12], 0 }
   0x4   :  { %20 = vsyncpa [#allocation15], 0 }
   0x5   :  { %21 = vsyncpa [#allocation4], 0  ;;  %s39_s19 = sshll.u32 %s1683_s1, 4  ;;  %s1533_s20 = smov [#allocation5]   ;;  %s40_s19 = int_to_ptr.hbm [resolvable:$true] %s39_s19 }
   0x6   :  { %s41_s21 = sshll.u32 %s1533_s20, 4  ;;  %s1534_s22 = smov 256   ;;  %s42_s21 = int_to_ptr.vmem [resolvable:$true] %s41_s21 }
   0x7   :  { %s1535_s23 = smov 16   ;;  %s65_s26 = sshll.u32 %s1685_s3, 4  ;;  %s66_s26 = int_to_ptr.hbm [resolvable:$true] %s65_s26 }
   0x8   :  { %47 = dma.hbm_to_vmem [thread:$0]  %s40_s19, 512, %s42_s21, [#allocation6], %s1534_s22, %s1534_s22, %s1535_s23  }
   0x9   :  { %s1536_s27 = smov [#allocation8]   ;;  %s91_s1 = sshll.u32 %s1687_s5, 4  ;;  %s92_s1 = int_to_ptr.hbm [resolvable:$true] %s91_s1 }
   0xa   :  { %s67_s28 = sshll.u32 %s1536_s27, 4  ;;  %s1537_s12 = smov 64   ;;  %s68_s28 = int_to_ptr.vmem [resolvable:$true] %s67_s28 }
   0xb   :  { %s1538_s13 = smov 4   ;;  %s117_s16 = sshll.u32 %s1689_s7, 4  ;;  %s118_s16 = int_to_ptr.hbm [resolvable:$true] %s117_s16 }
   0xc   :  { %73 = dma.hbm_to_vmem [thread:$0]  %s66_s26, 1024, %s68_s28, [#allocation9], %s1537_s12, %s1537_s12, %s1538_s13  }
   0xd   :  { %s1539_s3 = smov [#allocation11]   ;;  %s1540_s5 = smov [#allocation14]  }
   0xe   :  { %s93_s17 = sshll.u32 %s1539_s3, 4  ;;  %s119_s18 = sshll.u32 %s1540_s5, 4  ;;  %s94_s17 = int_to_ptr.vmem [resolvable:$true] %s93_s17  ;;  %s120_s18 = int_to_ptr.vmem [resolvable:$true] %s119_s18 }
   0xf   :  { %99 = dma.hbm_to_vmem [thread:$0]  %s92_s1, 1024, %s94_s17, [#allocation12], %s1537_s12, %s1537_s12, %s1538_s13  }
  0x10   :  { %s26_s21 = sshll.u32 %s1682_s0, 4  ;;  %s52_s25 = sshll.u32 %s1684_s2, 4  ;;  %s27_s21 = int_to_ptr.hbm [resolvable:$true] %s26_s21  ;;  %s53_s25 = int_to_ptr.hbm [resolvable:$true] %s52_s25 }
  0x11   :  { %125 = dma.hbm_to_vmem [thread:$0]  %s118_s16, 1024, %s120_s18, [#allocation15], %s1537_s12, %s1537_s12, %s1538_s13  }
  0x12   :  { %s1541_s26 = smov [#allocation2]   ;;  %s1542_s28 = smov [#allocation7]  }
  0x13   :  { %s28_s27 = sshll.u32 %s1541_s26, 4  ;;  %s54_s0 = sshll.u32 %s1542_s28, 4  ;;  %s29_s27 = int_to_ptr.vmem [resolvable:$true] %s28_s27  ;;  %s55_s0 = int_to_ptr.vmem [resolvable:$true] %s54_s0 }
  0x14   :  { %34 = dma.hbm_to_vmem [thread:$0]  %s27_s21, 512, %s29_s27, [#allocation3], %s1534_s22, %s1534_s22, %s1535_s23  }
  0x15   :  { %s78_s1 = sshll.u32 %s1686_s4, 4  ;;  %s104_s15 = sshll.u32 %s1688_s6, 4  ;;  %s79_s1 = int_to_ptr.hbm [resolvable:$true] %s78_s1  ;;  %s105_s15 = int_to_ptr.hbm [resolvable:$true] %s104_s15 }
  0x16   :  { %60 = dma.hbm_to_vmem [thread:$0]  %s53_s25, 2048, %s55_s0, [#allocation6], %s1537_s12, %s1537_s12, %s1538_s13  }
  0x17   :  { %s1543_s16 = smov [#allocation10]   ;;  %s1544_s17 = smov [#allocation13]  }
  0x18   :  { %s80_s3 = sshll.u32 %s1543_s16, 4  ;;  %s106_s4 = sshll.u32 %s1544_s17, 4  ;;  %s81_s3 = int_to_ptr.vmem [resolvable:$true] %s80_s3  ;;  %s107_s4 = int_to_ptr.vmem [resolvable:$true] %s106_s4 }
  0x19   :  { %86 = dma.hbm_to_vmem [thread:$0]  %s79_s1, 1536, %s81_s3, [#allocation9], %s1537_s12, %s1537_s12, %s1538_s13  }
  0x1a   :  { %s130_s19 = sshll.u32 %s1690_s8, 4  ;;  %s1545_s6 = smov [#allocation16]   ;;  %s131_s19 = int_to_ptr.hbm [resolvable:$true] %s130_s19 }
  0x1b   :  { %112 = dma.hbm_to_vmem [thread:$0]  %s105_s15, 1024, %s107_s4, [#allocation12], %s1537_s12, %s1537_s12, %s1538_s13  }
  0x1c   :  { %s132_s20 = sshll.u32 %s1545_s6, 4  ;;  %s133_s20 = int_to_ptr.vmem [resolvable:$true] %s132_s20 }
  0x1d   :  { %138 = dma.hbm_to_vmem [thread:$0]  %s131_s19, 1024, %s133_s20, [#allocation15], %s1537_s12, %s1537_s12, %s1538_s13  }
  0x1e   :  { %1521 = dma.done.wait [#allocation3], 512  }
  0x1f   :  { %1522 = vsyncadd [#allocation3], 4294966784 }
  0x20   :  { %1523 = dma.done.wait [#allocation6], 2560  }
  0x21   :  { %1524 = vsyncadd [#allocation6], 4294964736 }
  0x22   :  { %1525 = dma.done.wait [#allocation9], 2560  }
  0x23   :  { %1526 = vsyncadd [#allocation9], 4294964736 }
  0x24   :  { %1527 = dma.done.wait [#allocation12], 2048  }
  0x25   :  { %1528 = vsyncadd [#allocation12], 4294965248 }
  0x26   :  { %1529 = dma.done.wait [#allocation15], 2048  }
  0x27   :  { %1530 = vsyncadd [#allocation15], 4294965248  ;;  %v1201_v0 = vld [vmem:[#allocation7 + $0x38] sm:$0xff]  ;;  %v1200_v2 = vld [vmem:[#allocation7 + $0x30] sm:$0xff]  ;;  %vm534_vm0 = vcmask 523264   ;;  %s904_s1 = sshll.u32 %s1693_s11, 4  ;;  %s905_s1 = int_to_ptr.hbm [resolvable:$true] %s904_s1 }
  0x28   :  { %v1209_v1 = vld [vmem:[#allocation7 + $0x78] sm:$0xff]  ;;  %325 = vmatpush.bf16.msra.mxu0 %v1201_v0  ;;  %v1208_v3 = vld [vmem:[#allocation7 + $0x70] sm:$0xff]  ;;  %v1199_v4 = vld [vmem:[#allocation7 + $0x28] sm:$0xff] }
  0x29   :  { %339 = vmatpush.bf16.msra.mxu1 %v1209_v1  ;;  %v1207_v5 = vld [vmem:[#allocation7 + $0x68] sm:$0xff]  ;;  %v1225_v6 = vld [vmem:[#allocation10 + $0x38] sm:$0xff]  ;;  %v1224_v8 = vld [vmem:[#allocation10 + $0x30] sm:$0xff] }
  0x2a   :  { %v1217_v7 = vld [vmem:[#allocation8 + $0x38] sm:$0xff]  ;;  %538 = vmatpush.bf16.msra.mxu3 %v1225_v6  ;;  %v1216_v9 = vld [vmem:[#allocation8 + $0x30] sm:$0xff]  ;;  %v1198_v10 = vld [vmem:[#allocation7 + $0x20] sm:$0xff] }
  0x2b   :  { %421 = vmatpush.bf16.msra.mxu2 %v1217_v7  ;;  %v1206_v11 = vld [vmem:[#allocation7 + $0x60] sm:$0xff]  ;;  %v1223_v12 = vld [vmem:[#allocation10 + $0x28] sm:$0xff]  ;;  %v1197_v14 = vld [vmem:[#allocation7 + $0x18] sm:$0xff] }
  0x2c   :  { %326 = vmatpush.bf16.msra.mxu0 %v1200_v2  ;;  %v1215_v13 = vld [vmem:[#allocation8 + $0x28] sm:$0xff]  ;;  %v1205_v15 = vld [vmem:[#allocation7 + $0x58] sm:$0xff]  ;;  %v1222_v16 = vld [vmem:[#allocation10 + $0x20] sm:$0xff] }
  0x2d   :  { %340 = vmatpush.bf16.msra.mxu1 %v1208_v3  ;;  %v1214_v17 = vld [vmem:[#allocation8 + $0x20] sm:$0xff]  ;;  %v1196_v18 = vld [vmem:[#allocation7 + $0x10] sm:$0xff]  ;;  %v1221_v20 = vld [vmem:[#allocation10 + $0x18] sm:$0xff] }
  0x2e   :  { %539 = vmatpush.bf16.msra.mxu3 %v1224_v8  ;;  %v1204_v19 = vld [vmem:[#allocation7 + $0x50] sm:$0xff]  ;;  %v1195_v21 = vld [vmem:[#allocation7 + $0x8] sm:$0xff]  ;;  %v1194_v24 = vld [vmem:[#allocation7] sm:$0xff] }
  0x2f   :  { %422 = vmatpush.bf16.msra.mxu2 %v1216_v9  ;;  %v1203_v22 = vld [vmem:[#allocation7 + $0x48] sm:$0xff]  ;;  %v1220_v23 = vld [vmem:[#allocation10 + $0x10] sm:$0xff]  ;;  %v1202_v25 = vld [vmem:[#allocation7 + $0x40] sm:$0xff] }
  0x30   :  { %327 = vmatpush.bf16.msra.mxu0 %v1199_v4  ;;  %v180_v26 = vld [vmem:[#allocation2] sm:$0xff]  ;;  %v182_v27 = vld [vmem:[#allocation2 + $0x10] sm:$0xff]  ;;  %v181_v28 = vld [vmem:[#allocation2 + $0x8] sm:$0xff] }
  0x31   :  { %341 = vmatpush.bf16.msra.mxu1 %v1207_v5  ;;  %v183_v29 = vld [vmem:[#allocation2 + $0x18] sm:$0xff]  ;;  %v1219_v31 = vld [vmem:[#allocation10 + $0x8] sm:$0xff]  ;;  %v184_v32 = vpack.c.bf16 %v182_v27, %v180_v26  ;;  %v1218_v35 = vld [vmem:[#allocation10] sm:$0xff] }
  0x32   :  { %540 = vmatpush.bf16.msra.mxu3 %v1223_v12  ;;  %v1229_v30 = vld [vmem:[#allocation10 + $0x58] sm:$0xff]  ;;  %v185_v33 = vpack.c.bf16 %v183_v29, %v181_v28  ;;  %v1228_v36 = vld [vmem:[#allocation10 + $0x50] sm:$0xff]  ;;  %v186_v37 = vld [vmem:[#allocation5] sm:$0xff] }
  0x33   :  { %423 = vmatpush.bf16.msra.mxu2 %v1215_v13  ;;  %v1213_v34 = vld [vmem:[#allocation8 + $0x18] sm:$0xff]  ;;  %v188_v38 = vld [vmem:[#allocation5 + $0x10] sm:$0xff]  ;;  %v1227_v41 = vld [vmem:[#allocation10 + $0x48] sm:$0xff] }
  0x34   :  { %328 = vmatpush.bf16.msra.mxu0 %v1198_v10  ;;  %v190_v39 = vpack.c.bf16 %v188_v38, %v186_v37  ;;  %v1212_v40 = vld [vmem:[#allocation8 + $0x10] sm:$0xff]  ;;  %v1211_v42 = vld [vmem:[#allocation8 + $0x8] sm:$0xff]  ;;  %v1226_v43 = vld [vmem:[#allocation10 + $0x40] sm:$0xff] }
  0x35   :  { %342 = vmatpush.bf16.msra.mxu1 %v1206_v11  ;;  %v187_v44 = vld [vmem:[#allocation5 + $0x8] sm:$0xff]  ;;  %v189_v45 = vld [vmem:[#allocation5 + $0x18] sm:$0xff]  ;;  %v1210_v47 = vld [vmem:[#allocation8] sm:$0xff] }
  0x36   :  { %541 = vmatpush.bf16.msra.mxu3 %v1222_v16  ;;  %v191_v46 = vpack.c.bf16 %v189_v45, %v187_v44  ;;  %v1245_v48 = vld [vmem:[#allocation13 + $0x38] sm:$0xff]  ;;  %v1244_v50 = vld [vmem:[#allocation13 + $0x30] sm:$0xff]  ;;  %v1243_v53 = vld [vmem:[#allocation13 + $0x28] sm:$0xff] }
  0x37   :  { %424 = vmatpush.bf16.msra.mxu2 %v1214_v17  ;;  %v1261_v49 = vld [vmem:[#allocation16 + $0x38] sm:$0xff]  ;;  %v1260_v51 = vld [vmem:[#allocation16 + $0x30] sm:$0xff]  ;;  %v1259_v54 = vld [vmem:[#allocation16 + $0x28] sm:$0xff] }
  0x38   :  { %329 = vmatpush.bf16.msra.mxu0 %v1197_v14  ;;  %v1237_v52 = vld [vmem:[#allocation11 + $0x38] sm:$0xff]  ;;  %v1242_v55 = vld [vmem:[#allocation13 + $0x20] sm:$0xff]  ;;  %v1236_v5 = vld [vmem:[#allocation11 + $0x30] sm:$0xff] }
  0x39   :  { %343 = vmatpush.bf16.msra.mxu1 %v1205_v15  ;;  %v1258_v56 = vld [vmem:[#allocation16 + $0x20] sm:$0xff]  ;;  %v1241_v6 = vld [vmem:[#allocation13 + $0x18] sm:$0xff]  ;;  %v1235_v8 = vld [vmem:[#allocation11 + $0x28] sm:$0xff] }
  0x3a   :  { %542 = vmatpush.bf16.msra.mxu3 %v1221_v20  ;;  %v1276_v59 = vld [vmem:[%s1691_s9] ss:$0 sm:$0xff]  ;;  %v1257_v7 = vld [vmem:[#allocation16 + $0x18] sm:$0xff]  ;;  %v1240_v9 = vld [vmem:[#allocation13 + $0x10] sm:$0xff] }
  0x3b   :  { %425 = vmatpush.bf16.msra.mxu2 %v1213_v34  ;;  %v1256_v10 = vld [vmem:[#allocation16 + $0x10] sm:$0xff]  ;;  %v1234_v11 = vld [vmem:[#allocation11 + $0x20] sm:$0xff]  ;;  %v1239_v12 = vld [vmem:[#allocation13 + $0x8] sm:$0xff] }
  0x3c   :  { %330 = vmatpush.bf16.msra.mxu0 %v1196_v18  ;;  %v1255_v13 = vld [vmem:[#allocation16 + $0x8] sm:$0xff]  ;;  %v1277_v14 = vld [vmem:[%s1691_s9 + $0x2] ss:$0 sm:$0xff]  ;;  %v1232_v28 = vld [vmem:[#allocation11 + $0x10] sm:$0xff] }
  0x3d   :  { %344 = vmatpush.bf16.msra.mxu1 %v1204_v19  ;;  %v1254_v26 = vld [vmem:[#allocation16] sm:$0xff]  ;;  %v1249_v44 = vld [vmem:[#allocation14 + $0x18] sm:$0xff]  ;;  %v1248_v45 = vld [vmem:[#allocation14 + $0x10] sm:$0xff] }
  0x3e   :  { %543 = vmatpush.bf16.msra.mxu3 %v1220_v23 }
  0x3f   :  { %426 = vmatpush.bf16.msra.mxu2 %v1212_v40  ;;  %v1253_v40 = vld [vmem:[#allocation14 + $0x38] sm:$0xff] }
  0x40   :  { %331 = vmatpush.bf16.msra.mxu0 %v1195_v21  ;;  %v1233_v21 = vld [vmem:[#allocation11 + $0x18] sm:$0xff] }
  0x41   :  { %345 = vmatpush.bf16.msra.mxu1 %v1203_v22 }
  0x42   :  { %544 = vmatpush.bf16.msra.mxu3 %v1219_v31  ;;  %v1230_v31 = vld [vmem:[#allocation11] sm:$0xff] }
  0x43   :  { %427 = vmatpush.bf16.msra.mxu2 %v1211_v42  ;;  %v1251_v42 = vld [vmem:[#allocation14 + $0x28] sm:$0xff] }
  0x44   :  { %332 = vmatpush.bf16.msra.mxu0 %v1194_v24 }
  0x45   :  { %346 = vmatpush.bf16.msra.mxu1 %v1202_v25  ;;  %v1238_v25 = vld [vmem:[#allocation13] sm:$0xff] }
  0x46   :  { %545 = vmatpush.bf16.msra.mxu3 %v1218_v35 }
  0x47   :  { %333 = vmatmul.bf16.vlgmr.msra.gmra.mxu0 %v184_v32  ;;  %428 = vmatpush.bf16.msra.mxu2 %v1210_v47  ;;  %v1278_v32 = vld [vmem:[%s1691_s9 + $0x1] ss:$0 sm:$0xff] }
  0x48   :  { %556 = vmatpush.bf16.msrb.mxu0 %v1229_v30  ;;  %347 = vmatmul.bf16.vlgmr.msra.gmra.mxu1 %v185_v33  ;;  %v1231_v30 = vld [vmem:[#allocation11 + $0x8] sm:$0xff]  ;;  %v1246_v47 = vld [vmem:[#allocation14] sm:$0xff] }
  0x49   :  { %546 = vmatmul.bf16.vlgmr.msra.gmra.mxu3 %v190_v39  ;;  %650 = vmatpush.bf16.msrb.mxu1 %v1245_v48 }
  0x4a   :  { %812 = vmatpush.bf16.msrb.mxu3 %v1261_v49 }
  0x4b   :  { %712 = vmatpush.bf16.msrb.mxu2 %v1237_v52 }
  0x4c   :  { %557 = vmatpush.bf16.msrb.mxu0 %v1228_v36 }
  0x4d   :  { %651 = vmatpush.bf16.msrb.mxu1 %v1244_v50 }
  0x4e   :  { %813 = vmatpush.bf16.msrb.mxu3 %v1260_v51  ;;  %v1279_v51 = vld [vmem:[%s1691_s9 + $0x3] ss:$0 sm:$0xff]  ;;  %s1546_s9 = smov [#allocation17]  }
  0x4f   :  { %713 = vmatpush.bf16.msrb.mxu2 %v1236_v5  ;;  %s902_s0 = sshll.u32 %s1546_s9, 4  ;;  %s903_s0 = int_to_ptr.vmem [resolvable:$true] %s902_s0 }
  0x50   :  { %558 = vmatpush.bf16.msrb.mxu0 %v1227_v41  ;;  %v1252_v41 = vld [vmem:[#allocation14 + $0x30] sm:$0xff] }
  0x51   :  { %652 = vmatpush.bf16.msrb.mxu1 %v1243_v53 }
  0x52   :  { %814 = vmatpush.bf16.msrb.mxu3 %v1259_v54 }
  0x53   :  { %714 = vmatpush.bf16.msrb.mxu2 %v1235_v8 }
  0x54   :  { %559 = vmatpush.bf16.msrb.mxu0 %v1226_v43  ;;  %v1250_v43 = vld [vmem:[#allocation14 + $0x20] sm:$0xff] }
  0x55   :  { %653 = vmatpush.bf16.msrb.mxu1 %v1242_v55 }
  0x56   :  { %815 = vmatpush.bf16.msrb.mxu3 %v1258_v56 }
  0x57   :  { %1065 = vmatmul.msk.bf16.vlgmr.msrb.gmra.mxu0 %vm534_vm0, %v191_v46  ;;  %715 = vmatpush.bf16.msrb.mxu2 %v1234_v11  ;;  %v1247_v46 = vld [vmem:[#allocation14 + $0x8] sm:$0xff] }
  0x58   :  { %874 = vmatpush.bf16.msra.mxu0 %v1253_v40 }
  0x59   :  { %654 = vmatpush.bf16.msrb.mxu1 %v1241_v6 }
  0x5a   :  { %816 = vmatpush.bf16.msrb.mxu3 %v1257_v7 }
  0x5b   :  { %716 = vmatpush.bf16.msrb.mxu2 %v1233_v21 }
  0x5c   :  { %875 = vmatpush.bf16.msra.mxu0 %v1252_v41 }
  0x5d   :  { %655 = vmatpush.bf16.msrb.mxu1 %v1240_v9 }
  0x5e   :  { %817 = vmatpush.bf16.msrb.mxu3 %v1256_v10 }
  0x5f   :  { %717 = vmatpush.bf16.msrb.mxu2 %v1232_v28 }
  0x60   :  { %876 = vmatpush.bf16.msra.mxu0 %v1251_v42 }
  0x61   :  { %656 = vmatpush.bf16.msrb.mxu1 %v1239_v12 }
  0x62   :  { %818 = vmatpush.bf16.msrb.mxu3 %v1255_v13 }
  0x63   :  { %718 = vmatpush.bf16.msrb.mxu2 %v1231_v30 }
  0x64   :  { %877 = vmatpush.bf16.msra.mxu0 %v1250_v43 }
  0x65   :  { %657 = vmatpush.bf16.msrb.mxu1 %v1238_v25 }
  0x66   :  { %819 = vmatpush.bf16.msrb.mxu3 %v1254_v26 }
  0x67   :  { %719 = vmatpush.bf16.msrb.mxu2 %v1230_v31 }
  0x68   :  { %878 = vmatpush.bf16.msra.mxu0 %v1249_v44 }
  0x6c   :  { %879 = vmatpush.bf16.msra.mxu0 %v1248_v45 }
  0x70   :  { %880 = vmatpush.bf16.msra.mxu0 %v1247_v46 }
  0x74   :  { %881 = vmatpush.bf16.msra.mxu0 %v1246_v47 }
  0xc4   :  { %v334_v57 = vpop.f32.mrf.mxu0 }
  0xc5   :  { %v348_v58 = vpop.f32.mrf.mxu1  ;;  %v335_v60 = vadd.f32 %v1276_v59, %v334_v57 }
  0xc7   :  { %v349_v62 = vadd.f32 %v348_v58, %v335_v60 }
  0xc9   :  { %v353_v2 = vmax.f32 %v349_v62, 0.0 }
  0xcc   :  { %v336_v61 = vpop.f32.mrf.mxu0  ;;  %v547_v15 = vpop.f32.mrf.mxu3 }
  0xcd   :  { %v337_v63 = vadd.f32 %v1276_v59, %v336_v61  ;;  %v350_v0 = vpop.f32.mrf.mxu1  ;;  %v548_v17 = vadd.f32 %v1277_v14, %v547_v15  ;;  %v1280_v61 = vld [vmem:[%s1692_s10] ss:$0 sm:$0xff] }
  0xcf   :  { %v351_v1 = vadd.f32 %v350_v0, %v337_v63 }
  0xd1   :  { %v354_v3 = vmax.f32 %v351_v1, 0.0 }
  0xd3   :  { %v355_v4 = vpack.c.bf16 %v354_v3, %v353_v2 }
  0xd4   :  { %v561_v16 = vpop.f32.mrf.mxu0  ;;  %v549_v19 = vpop.f32.mrf.mxu3 }
  0xd5   :  { %429 = vmatmul.bf16.vlgmr.msra.gmra.mxu2 %v355_v4  ;;  %v562_v18 = vadd.f32 %v561_v16, %v548_v17  ;;  %v550_v20 = vadd.f32 %v1277_v14, %v549_v19 }
  0xd7   :  { %v566_v23 = vmax.f32 %v562_v18, 0.0 }
  0xdc   :  { %v563_v22 = vpop.f32.mrf.mxu0 }
  0xdd   :  { %v564_v24 = vadd.f32 %v563_v22, %v550_v20 }
  0xdf   :  { %v567_v27 = vmax.f32 %v564_v24, 0.0 }
  0xe1   :  { %v569_v29 = vpack.c.bf16 %v567_v27, %v566_v23 }
  0xe3   :  { %658 = vmatmul.bf16.vlgmr.msrb.gmra.mxu1 %v569_v29  ;;  %820 = vmatmul.bf16.vlgmr.msrb.gmra.mxu3 %v569_v29 }
 0x158   :  { %v430_v33 = vpop.f32.mrf.mxu2 }
 0x159   :  { %v431_v34 = vadd.f32 %v1278_v32, %v430_v33 }
 0x15b   :  { %v435_v35 = vmax.f32 %v431_v34, 0.0 }
 0x15d   :  { %894 = vst [vmem:[#allocation17] sm:$0xff] %v435_v35 }
 0x160   :  { %v432_v36 = vpop.f32.mrf.mxu2  ;;  %v659_v48 = vpop.f32.mrf.mxu1 }
 0x161   :  { %v433_v37 = vadd.f32 %v1278_v32, %v432_v36 }
 0x163   :  { %v436_v38 = vmax.f32 %v433_v37, 0.0 }
 0x165   :  { %v568_v39 = vpack.c.bf16 %v436_v38, %v435_v35  ;;  %895 = vst [vmem:[#allocation17 + $0x10] sm:$0xff] %v436_v38 }
 0x166   :  { %v821_v60 = vpop.f32.mrf.mxu3 }
 0x167   :  { %720 = vmatmul.bf16.vlgmr.msrb.gmra.mxu2 %v568_v39 }
 0x168   :  { %v661_v52 = vpop.f32.mrf.mxu1 }
 0x16e   :  { %v823_v1 = vpop.f32.mrf.mxu3 }
 0x1ea   :  { %v721_v49 = vpop.f32.mrf.mxu2 }
 0x1eb   :  { %v722_v50 = vadd.f32 %v721_v49, %v659_v48 }
 0x1ed   :  { %v727_v54 = vadd.f32 %v1279_v51, %v722_v50 }
 0x1ef   :  { %v729_v57 = vmax.f32 %v727_v54, 0.0 }
 0x1f2   :  { %v723_v53 = vpop.f32.mrf.mxu2 }
 0x1f3   :  { %v724_v55 = vadd.f32 %v723_v53, %v661_v52 }
 0x1f5   :  { %v728_v56 = vadd.f32 %v1279_v51, %v724_v55 }
 0x1f7   :  { %v730_v58 = vmax.f32 %v728_v56, 0.0 }
 0x1f9   :  { %v731_v59 = vpack.c.bf16 %v730_v58, %v729_v57 }
 0x1fb   :  { %882 = vmatmul.bf16.vlgmr.msra.gmra.mxu0 %v731_v59 }
 0x278   :  { %v883_v62 = vpop.f32.mrf.mxu0 }
 0x279   :  { %v884_v63 = vadd.f32 %v883_v62, %v821_v60 }
 0x27b   :  { %v892_v0 = vadd.f32 %v1280_v61, %v884_v63 }
 0x27d   :  { %896 = vst [vmem:[#allocation17 + $0x8] sm:$0xff] %v892_v0 }
 0x280   :  { %v885_v2 = vpop.f32.mrf.mxu0 }
 0x281   :  { %v886_v3 = vadd.f32 %v885_v2, %v823_v1 }
 0x283   :  { %v893_v4 = vadd.f32 %v1280_v61, %v886_v3 }
 0x285   :  { %897 = vst [vmem:[#allocation17 + $0x18] sm:$0xff] %v893_v4 }
 0x286   :  { %910 = dma.vmem_to_hbm [thread:$0]  %s903_s0, 512, %s905_s1, [#allocation4], %s1534_s22, %s1534_s22, %s1535_s23  }
 0x287   :  { %1531 = dma.done.wait [#allocation4], 512  }
 0x288   :  { %1532 = vsyncadd [#allocation4], 4294966784 }
 0x289   :  { %915 = vsyncpa [#allocation3], 1 }
 0x28a   :  { %916 = vsyncpa [#allocation6], 1 }
 0x28b   :  { %917 = vsyncpa [#allocation9], 1 }
 0x28c   :  { %918 = vsyncpa [#allocation12], 1 }
 0x28d   :  { %919 = vsyncpa [#allocation15], 1 }
 0x28e   :  { %920 = vsyncpa [#allocation4], 1 }

</bundles_post_ra>
